<compile_context>
chip_gen: v5e
topology: v5e:2x2
jax: 0.10.0
libtpu: 0.0.40
codegen_flags: <defaults>
</compile_context>

<pallas_src>
import functools

import numpy as np
import jax
import jax.numpy as jnp
from jax.experimental import pallas as pl
from jax.experimental.pallas import tpu as pltpu


def gaussian_kernel_weights(size: int, sigma: float) -> np.ndarray:
    """Matches gaussian_kernel() in the PyTorch reference (torch.arange semantics)."""
    x = np.arange(-size // 2 + 1.0, size // 2 + 1.0, dtype=np.float64)
    k = np.exp(-0.5 * (x / sigma) ** 2)
    return (k / k.sum()).astype(np.float32)


def _round_up(v: int, m: int) -> int:
    return (v + m - 1) // m * m


def _vmem_capacity_bytes() -> int:
    try:
        return int(pltpu.get_tpu_info().vmem_capacity_bytes)
    except Exception:
        return 64 * 1024 * 1024  # conservative: assume v7x-sized VMEM


def _choose_row_tile(n_rows: int, work_lanes: int, in_itemsize: int,
                     vmem_cap: int) -> int:
    """Rows per block: dtype-aware sublane multiple, generation-aware size."""
    sub = max(8, 32 // max(1, in_itemsize))     # 8 (f32) / 16 (bf16) / 32 (int8)
    if n_rows <= sub:
        return n_rows                            # full dim is always legal
    big_vmem = vmem_cap >= 100 * 1024 * 1024     # v5e/v6e 128 MiB vs v7x 64 MiB
    # Block target; live VMEM is roughly 6-8x this (double-buffered in/out,
    # the f32 scratch and the kernel's f32 value temporaries).
    target_bytes = (4 if big_vmem else 2) * 1024 * 1024
    rt = max(sub, min(n_rows, target_bytes // (work_lanes * 4)))
    rt = (rt // sub) * sub
    # Keep at least 2 grid steps so both TensorCores get work on megacore parts.
    rt = min(rt, max(sub, _round_up((n_rows + 1) // 2, sub)))
    return max(sub, rt)


def _gauss1d_same_kernel(x_ref, o_ref, xw_ref, *, taps, pad_left, valid_len):
    """One row-tile of 'same' 1-D cross-correlation.

    x_ref : VMEM (r_tile, L)      raw input rows (no HBM-side padding).
    o_ref : VMEM (r_tile, L)      output rows.
    xw_ref: VMEM (r_tile, L_pad)  f32 scratch, L_pad a multiple of 128 with
                                  >= max-shift lanes of slack beyond L.
    taps  : tuple of compile-time Python floats (the gaussian kernel).
    """
    l_pad = xw_ref.shape[-1]

    # Copy the tile into the lane-aligned scratch (masked store on the final
    # vreg), then zero every lane >= valid_len once: this covers both the
    # 'same' zero halo and the scratch lanes the copy did not touch.
    xw_ref[:, :valid_len] = x_ref[...].astype(jnp.float32)
    xw = xw_ref[...]
    lane = jax.lax.broadcasted_iota(jnp.int32, xw.shape, 1)
    xw = jnp.where(lane < valid_len, xw, 0.0)

    # Center tap initializes the accumulator (no zeros + add).
    acc = taps[pad_left] * xw

    # Remaining taps: out[l] += w[k] * x[l + d], d = k - pad_left.  Shifts are
    # aligned-width lane rotations (XLU slot); the wrapped lanes only ever land
    # in (or come from) lanes >= valid_len, which are zero or discarded, so no
    # per-tap masking is needed.
    for k, w_k in enumerate(taps):
        d = k - pad_left
        if d == 0:
            continue
        acc = acc + w_k * pltpu.roll(xw, shift=(-d) % l_pad, axis=1)

    o_ref[...] = acc[:, :valid_len].astype(o_ref.dtype)


def gaussian_filter_forward(signal: jnp.ndarray, weights) -> jnp.ndarray:
    """Equivalent of gaussian_filter.forward(signal).

    signal : (N, C, L) with C == 1 (the conv1d filter has in_channels = 1)
    weights: (size,) gaussian taps (the (1, 1, size) parameter, squeezed);
             must be concrete (they are static module parameters).
    """
    assert signal.ndim == 3
    N, C, L = signal.shape
    assert C == 1, "conv1d filter has in_channels=1, so signal must have 1 channel"

    taps = tuple(float(v) for v in np.asarray(weights, dtype=np.float32).reshape(-1))
    ksize = len(taps)
    # torch conv1d(padding='same'): total = ksize-1, left = total//2, extra right.
    pad_left = (ksize - 1) // 2
    max_shift = max(pad_left, (ksize - 1) - pad_left)

    R = N * C
    x2d = signal.reshape(R, L)

    # Aligned scratch width: enough zero slack beyond L to absorb every shift.
    L_pad = _round_up(L + max_shift, 128)

    vmem_cap = _vmem_capacity_bytes()
    r_tile = _choose_row_tile(R, L_pad, jnp.dtype(signal.dtype).itemsize, vmem_cap)
    vmem_limit = max(32 * 1024 * 1024,
                     min(vmem_cap * 3 // 4, 96 * 1024 * 1024))
    grid = (pl.cdiv(R, r_tile),)

    out2d = pl.pallas_call(
        functools.partial(_gauss1d_same_kernel, taps=taps, pad_left=pad_left,
                          valid_len=L),
        out_shape=jax.ShapeDtypeStruct((R, L), signal.dtype),
        grid=grid,
        in_specs=[pl.BlockSpec((r_tile, L), lambda i: (i, 0))],
        out_specs=pl.BlockSpec((r_tile, L), lambda i: (i, 0)),
        scratch_shapes=[pltpu.VMEM((r_tile, L_pad), jnp.float32)],
        compiler_params=pltpu.CompilerParams(
            dimension_semantics=("parallel",),   # rows are independent
            vmem_limit_bytes=vmem_limit,
        ),
    )(x2d)

    return out2d.reshape(N, C, L)


if __name__ == "__main__":
    # Deterministic parameters (matches the module __init__ shapes/values).
    SIZE, SIGMA = 5, 1.5
    filters = gaussian_kernel_weights(SIZE, SIGMA)   # the (1,1,SIZE) parameter, squeezed

    def ref_conv_same(sig, w):
        sig64 = np.asarray(sig, dtype=np.float64)
        w64 = np.asarray(w, dtype=np.float64)
        k = w64.shape[0]
        pad_left = (k - 1) // 2
        padded = np.pad(sig64, ((0, 0), (0, 0), (pad_left, (k - 1) - pad_left)))
        L = sig64.shape[-1]
        out = np.zeros_like(sig64)
        for t in range(k):
            out += w64[t] * padded[:, :, t:t + L]
        return out

    key = jax.random.PRNGKey(0)
    # (2,1,16): tiny-L shape from the module; (20,1,300): multi-block row grid,
    # non-128 L, partial edge row block; (9,1,128): L a multiple of 128 plus a
    # 1-row partial block.
    for shape in [(2, 1, 16), (20, 1, 300), (9, 1, 128)]:
        key, sub = jax.random.split(key)
        signal = jax.random.normal(sub, shape, dtype=jnp.float32)
        out = jax.block_until_ready(gaussian_filter_forward(signal, filters))
        ref = ref_conv_same(np.asarray(signal), filters)
        assert out.shape == signal.shape, shape
        assert np.allclose(np.asarray(out), ref, atol=1e-5, rtol=1e-5), shape

    print("KERNEL_OK")
</pallas_src>

<mosaic_0001>
module attributes {stable_mosaic.version = 11 : i64} {
  func.func @_gauss1d_same_kernel(%arg0: i32, %arg1: memref<2x16xf32, #tpu.memory_space<vmem>>, %arg2: memref<2x16xf32, #tpu.memory_space<vmem>>, %arg3: memref<2x128xf32, #tpu.memory_space<vmem>>) attributes {dimension_semantics = [#tpu.dimension_semantics<parallel>], iteration_bounds = array<i64: 1>, scalar_prefetch = 0 : i64, scratch_operands = 1 : i64, tpu.core_type = #tpu.core_type<tc>, window_params = [{transform_indices = @transform_0, window_bounds = array<i64: 2, 16>}, {transform_indices = @transform_1, window_bounds = array<i64: 2, 16>}]} {
    %c0 = arith.constant 0 : index
    %c0_0 = arith.constant 0 : index
    %0 = vector.load %arg1[%c0, %c0_0] : memref<2x16xf32, #tpu.memory_space<vmem>>, vector<2x16xf32>
    %c0_1 = arith.constant 0 : index
    %c0_2 = arith.constant 0 : index
    %1 = vector.load %arg3[%c0_1, %c0_2] : memref<2x128xf32, #tpu.memory_space<vmem>>, vector<2x16xf32>
    tpu.vector_store %arg3[%c0_1, %c0_2], %0 {strides = array<i32>} : memref<2x128xf32, #tpu.memory_space<vmem>>, vector<2x16xf32>,
    %c0_3 = arith.constant 0 : index
    %c0_4 = arith.constant 0 : index
    %2 = vector.load %arg3[%c0_3, %c0_4] : memref<2x128xf32, #tpu.memory_space<vmem>>, vector<2x128xf32>
    %3 = tpu.iota {dimensions = array<i32: 1>} : vector<2x128xi32>
    %c16_i32 = arith.constant 16 : i32
    %4 = vector.broadcast %c16_i32 : i32 to vector<2x128xi32>
    %5 = arith.cmpi slt, %3, %4 : vector<2x128xi32>
    %cst = arith.constant 0.000000e+00 : f32
    %6 = vector.broadcast %cst : f32 to vector<2x128xf32>
    %7 = arith.select %5, %2, %6 : vector<2x128xi1>, vector<2x128xf32>
    %cst_5 = arith.constant 0.292081714 : f32
    %8 = vector.broadcast %cst_5 : f32 to vector<2x128xf32>
    %9 = arith.mulf %8, %7 : vector<2x128xf32>
    %c2_i32 = arith.constant 2 : i32
    %10 = tpu.dynamic_rotate %7 by %c2_i32 dim 1 : vector<2x128xf32>, i32 -> vector<2x128xf32>
    %cst_6 = arith.constant 0.120078385 : f32
    %11 = vector.broadcast %cst_6 : f32 to vector<2x128xf32>
    %12 = arith.mulf %11, %10 : vector<2x128xf32>
    %13 = arith.addf %9, %12 : vector<2x128xf32>
    %c1_i32 = arith.constant 1 : i32
    %14 = tpu.dynamic_rotate %7 by %c1_i32 dim 1 : vector<2x128xf32>, i32 -> vector<2x128xf32>
    %cst_7 = arith.constant 0.233880758 : f32
    %15 = vector.broadcast %cst_7 : f32 to vector<2x128xf32>
    %16 = arith.mulf %15, %14 : vector<2x128xf32>
    %17 = arith.addf %13, %16 : vector<2x128xf32>
    %c127_i32 = arith.constant 127 : i32
    %18 = tpu.dynamic_rotate %7 by %c127_i32 dim 1 : vector<2x128xf32>, i32 -> vector<2x128xf32>
    %cst_8 = arith.constant 0.233880758 : f32
    %19 = vector.broadcast %cst_8 : f32 to vector<2x128xf32>
    %20 = arith.mulf %19, %18 : vector<2x128xf32>
    %21 = arith.addf %17, %20 : vector<2x128xf32>
    %c126_i32 = arith.constant 126 : i32
    %22 = tpu.dynamic_rotate %7 by %c126_i32 dim 1 : vector<2x128xf32>, i32 -> vector<2x128xf32>
    %cst_9 = arith.constant 0.120078385 : f32
    %23 = vector.broadcast %cst_9 : f32 to vector<2x128xf32>
    %24 = arith.mulf %23, %22 : vector<2x128xf32>
    %25 = arith.addf %21, %24 : vector<2x128xf32>
    %26 = vector.extract_strided_slice %25 {offsets = [0, 0], sizes = [2, 16], strides = [1, 1]} : vector<2x128xf32> to vector<2x16xf32>
    %c0_10 = arith.constant 0 : index
    %c0_11 = arith.constant 0 : index
    %27 = vector.load %arg2[%c0_10, %c0_11] : memref<2x16xf32, #tpu.memory_space<vmem>>, vector<2x16xf32>
    tpu.vector_store %arg2[%c0_10, %c0_11], %26 {strides = array<i32>} : memref<2x16xf32, #tpu.memory_space<vmem>>, vector<2x16xf32>,
    return
  }
  func.func @transform_0(%arg0: i32) -> (i32, i32) {
    %c0_i32 = arith.constant 0 : i32
    %c0_i32_0 = arith.constant 0 : i32
    return %arg0, %c0_i32 : i32, i32
  }
  func.func @transform_1(%arg0: i32) -> (i32, i32) {
    %c0_i32 = arith.constant 0 : i32
    %c0_i32_0 = arith.constant 0 : i32
    return %arg0, %c0_i32 : i32, i32
  }
}

</mosaic_0001>

<bundles_post_ra>
// kernel: tpu_custom_call.1
= control target key start
LH: loop header
LB: loop body
LE: loop exit
PB: predicated region body
PF: predicated region fallthrough
CT: control target
= control target key end

     0   :  { %6 = vsyncpa [#allocation4], 0  ;;  %s148_s0 = inlined_call_operand.hbm [shape: f32[2,16], index: 0, kind: input, shape index: {}]   ;;  %s149_s1 = inlined_call_operand.hbm [shape: f32[2,16], index: 1, kind: output, shape index: {}]  }
   0x1   :  { %7 = vsyncpa [#allocation5], 0  ;;  %s13_s8 = sshll.u32 %s148_s0, 4  ;;  %s124_s9 = smov [#allocation3]   ;;  %s14_s8 = int_to_ptr.hbm [resolvable:$true] %s13_s8 }
   0x2   :  { %s15_s10 = sshll.u32 %s124_s9, 4  ;;  %s16_s10 = int_to_ptr.vmem [resolvable:$true] %s15_s10 }
   0x3   :  { %18 = dma.hbm_to_vmem [thread:$0]  %s14_s8, 32, %s16_s10, [#allocation4]  }
   0x4   :  { %120 = dma.done.wait [#allocation4], 32  }
   0x5   :  { %121 = vsyncadd [#allocation4], 4294967264  ;;  %vm24_vm0 = vcmask 123904   ;;  %v27_v0 = vlaneseq  ;;  %v23_v1 = vld [vmem:[#allocation3] sm:$0x3]  ;;  %s125_s11 = smov 2  }
   0x6   :  { %25 = vst.msk [vmem:[#allocation2] sm:$0x3] %vm24_vm0, %v23_v1  ;;  %s126_s12 = smov 127   ;;  %s127_s0 = smov 1  }
   0x7   :  { %v28_v2 = vand.u32 127, %v27_v0  ;;  %s128_s13 = smov 126   ;;  %s129_s14 = smov [#allocation6]  }
   0x8   :  { %s54_s15 = sshll.u32 %s129_s14, 4  ;;  %s56_s18 = sshll.u32 %s149_s1, 4  ;;  %s55_s15 = int_to_ptr.vmem [resolvable:$true] %s54_s15  ;;  %s57_s18 = int_to_ptr.hbm [resolvable:$true] %s56_s18 }
   0x9   :  { %vm29_vm1 = vcmp.lt.s32.totalorder %v28_v2, 16 }
   0xd   :  { %v26_v3 = vld [vmem:[#allocation2] sm:$0x3] }
   0xe   :  { %v30_v4 = vsel %vm29_vm1, %v26_v3, 0.0 }
   0xf   :  { %32 = vrot.lane.b32.xlu0 %v30_v4, %s125_s11  ;;  %40 = vrot.lane.b32.xlu1 %v30_v4, %s126_s12  ;;  %v31_v7 = vmul.f32 0.2920817, %v30_v4 }
  0x17   :  { %36 = vrot.lane.b32.xlu0 %v30_v4, %s127_s0  ;;  %44 = vrot.lane.b32.xlu1 %v30_v4, %s128_s13 }
  0x81   :  { %v33_v5 = vpop.permute.xlu0 %32  ;;  %v41_v6 = vpop.permute.xlu1 %40 }
  0x82   :  { %v34_v8 = vmul.f32 0.120078385, %v33_v5  ;;  %v42_v13 = vmul.f32 0.23388076, %v41_v6 }
  0x84   :  { %v35_v11 = vadd.f32 %v34_v8, %v31_v7 }
  0x89   :  { %v37_v9 = vpop.permute.xlu0 %36  ;;  %v45_v10 = vpop.permute.xlu1 %44 }
  0x8a   :  { %v38_v12 = vmul.f32 0.23388076, %v37_v9  ;;  %v46_v15 = vmul.f32 0.120078385, %v45_v10 }
  0x8c   :  { %v39_v14 = vadd.f32 %v38_v12, %v35_v11 }
  0x8e   :  { %v43_v16 = vadd.f32 %v42_v13, %v39_v14 }
  0x90   :  { %v47_v17 = vadd.f32 %v46_v15, %v43_v16 }
  0x92   :  { %48 = vst.msk [vmem:[#allocation6] sm:$0x3] %vm24_vm0, %v47_v17 }
  0x93   :  { %59 = dma.vmem_to_hbm [thread:$0]  %s55_s15, 32, %s57_s18, [#allocation5]  }
  0x94   :  { %122 = dma.done.wait [#allocation5], 32  }
  0x95   :  { %123 = vsyncadd [#allocation5], 4294967264 }
  0x96   :  { %64 = vsyncpa [#allocation4], 1 }
  0x97   :  { %65 = vsyncpa [#allocation5], 1 }

</bundles_post_ra>
